<compile_context>
chip_gen: v7x
topology: tpu7x:2x2x1
jax: 0.10.0
libtpu: 0.0.40
codegen_flags: <defaults>
</compile_context>

<pallas_src>
import functools
import numpy as np
import jax
import jax.numpy as jnp
from jax.experimental import pallas as pl
from jax.experimental.pallas import tpu as pltpu

LANE = 128


def _round_up(n, m):
    return ((n + m - 1) // m) * m


def _cdiv(a, b):
    return -(-a // b)


# ----------------------------------------------------------------------------
# Exact reproduction of MADE.update_masks() for natural_ordering=True, num_masks=1
# ----------------------------------------------------------------------------
def build_made_masks(nin, hidden_sizes, nout, seed=0):
    L = len(hidden_sizes)
    rng = np.random.RandomState(seed)
    m = {}
    m[-1] = np.arange(nin)  # natural ordering
    for l in range(L):
        m[l] = rng.randint(m[l - 1].min(), nin - 1, size=hidden_sizes[l])
    masks = [m[l - 1][:, None] <= m[l][None, :] for l in range(L)]
    masks.append(m[L - 1][:, None] < m[-1][None, :])
    if nout > nin:
        k = int(nout / nin)
        masks[-1] = np.concatenate([masks[-1]] * k, axis=1)
    # each mask has shape (in_features, out_features) -> matches x @ W layout
    return [np.asarray(mk, dtype=np.float32) for mk in masks]


# ----------------------------------------------------------------------------
# Pallas kernel: 4 pre-masked linears with ReLU between (last layer no ReLU).
# Matmuls run in the weight dtype (bf16 on the fast path) with f32 MXU
# accumulation; bias-add / ReLU stay f32 (v5e VPU has no bf16 path).
# ----------------------------------------------------------------------------
def armlp_kernel(x_ref,
                 w1_ref, b1_ref,
                 w2_ref, b2_ref,
                 w3_ref, b3_ref,
                 w4_ref, b4_ref,
                 o_ref):
    cdt = w1_ref.dtype
    h = x_ref[...]
    h = jnp.dot(h.astype(cdt), w1_ref[...],
                preferred_element_type=jnp.float32) + b1_ref[...]
    h = jnp.maximum(h, 0.0)
    h = jnp.dot(h.astype(cdt), w2_ref[...],
                preferred_element_type=jnp.float32) + b2_ref[...]
    h = jnp.maximum(h, 0.0)
    h = jnp.dot(h.astype(cdt), w3_ref[...],
                preferred_element_type=jnp.float32) + b3_ref[...]
    h = jnp.maximum(h, 0.0)
    o_ref[...] = jnp.dot(h.astype(cdt), w4_ref[...],
                         preferred_element_type=jnp.float32) + b4_ref[...]


# ----------------------------------------------------------------------------
# One-time (build-time) parameter prep: fold masks, pad only hidden dims.
# ----------------------------------------------------------------------------
def prepare_armlp(params, masks, *, compute_dtype=jnp.bfloat16):
    """params: list of (W(in,out), b(1,out)); masks: list of (in,out).
    Folds the static masks into the weights and zero-pads only the *hidden*
    feature dims to the 128-lane width.  nin (W1 input side) and nout (W4
    output side) are left unpadded so the batched HBM DMA only moves real data.
    Zero padding preserves the autoregressive property exactly."""
    nin = params[0][0].shape[0]
    nout = params[-1][0].shape[1]
    fused = [(w * mk, b) for (w, b), mk in zip(params, masks)]
    dims = [nin] + [w.shape[1] for w, _ in fused]                # [nin, nh, nh, nh, nout]
    pdims = [nin] + [_round_up(d, LANE) for d in dims[1:-1]] + [nout]
    pw, pb = [], []
    for (w, b), din, dout in zip(fused, pdims[:-1], pdims[1:]):
        wpad = jnp.pad(w, ((0, din - w.shape[0]), (0, dout - w.shape[1])))
        bpad = jnp.pad(b, ((0, 0), (0, dout - b.shape[1])))
        pw.append(wpad.astype(compute_dtype))
        pb.append(bpad.astype(jnp.float32))                      # bias-add stays f32
    return tuple(pw), tuple(pb)


# ----------------------------------------------------------------------------
# Batch tiling heuristic + jitted pallas_call wrapper
# ----------------------------------------------------------------------------
def _pick_tiling(B, *, target_bm=1024, min_steps=4):
    """Choose (grid, bm): tiles of ~target_bm rows amortize the ~0.35us per-step
    overhead, while keeping >= min_steps steps for large batches (so both v7x
    TensorCores get pipelined work) and capping batch-remainder padding."""
    if B <= 8:
        return 1, 8
    grid = max(_cdiv(B, target_bm), min(min_steps, _cdiv(B, 256)))
    bm = _round_up(_cdiv(B, grid), 8)
    grid = _cdiv(B, bm)
    return grid, bm


@functools.partial(jax.jit, static_argnames=("bm",))
def _armlp_pallas(xp, pw, pb, *, bm):
    Bp, nin = xp.shape
    nout = pb[-1].shape[1]

    batch_map = lambda i: (i, 0)
    const_map = lambda i: (0, 0)   # weights/biases stay VMEM-resident across tiles

    in_specs = [pl.BlockSpec((bm, nin), batch_map)]
    args = [xp]
    for w, b in zip(pw, pb):
        in_specs.append(pl.BlockSpec(w.shape, const_map))
        in_specs.append(pl.BlockSpec(b.shape, const_map))
        args += [w, b]

    return pl.pallas_call(
        armlp_kernel,
        out_shape=jax.ShapeDtypeStruct((Bp, nout), jnp.float32),
        grid_spec=pltpu.PrefetchScalarGridSpec(
            num_scalar_prefetch=0,
            grid=(Bp // bm,),
            in_specs=in_specs,
            out_specs=pl.BlockSpec((bm, nout), batch_map),
        ),
        compiler_params=pltpu.CompilerParams(
            dimension_semantics=("parallel",),      # shard batch tiles across TCs
            vmem_limit_bytes=32 * 1024 * 1024,      # portable to v7x's 64 MiB VMEM
        ),
    )(*args)


def armlp_forward(x, pw, pb, *, bm=None):
    """x: (B, nin) f32; pw/pb from prepare_armlp().  Returns (B, nout) f32."""
    B = x.shape[0]
    if bm is None:
        grid, bm = _pick_tiling(B)
    else:
        grid = _cdiv(B, bm)
    Bp = grid * bm
    xp = jnp.pad(x, ((0, Bp - B), (0, 0))) if Bp != B else x   # batch pad only
    out = _armlp_pallas(xp, pw, pb, bm=bm)
    return out[:B] if Bp != B else out


# ----------------------------------------------------------------------------
# Deterministic parameter init (same shapes / bound convention as nn.Linear)
# ----------------------------------------------------------------------------
def init_params(key, nin, nh, nout):
    dims = [nin, nh, nh, nh, nout]
    params = []
    for fan_in, fan_out in zip(dims[:-1], dims[1:]):
        key, kw, kb = jax.random.split(key, 3)
        bound = 1.0 / np.sqrt(fan_in)
        w = jax.random.uniform(kw, (fan_in, fan_out), jnp.float32, -bound, bound)
        b = jax.random.uniform(kb, (1, fan_out), jnp.float32, -bound, bound)
        params.append((w, b))
    return params


def ref_forward(x, params, masks):
    h = x
    n = len(params)
    for i, ((w, b), mk) in enumerate(zip(params, masks)):
        h = h @ (w * mk) + b
        if i < n - 1:
            h = jnp.maximum(h, 0.0)
    return h


if __name__ == "__main__":
    nin, nout, nh = 4, 8, 32    # nout = 2 * nin (e.g. mean/std per input dim)
    batch = 8

    key = jax.random.PRNGKey(0)
    key, kx = jax.random.split(key)
    x = jax.random.normal(kx, (batch, nin), jnp.float32)

    params = init_params(key, nin, nh, nout)
    masks = [jnp.asarray(m) for m in build_made_masks(nin, [nh, nh, nh], nout, seed=0)]
    ref = ref_forward(x, params, masks)

    # --- f32 path: must match the reference exactly (single tile, grid=(1,)) ---
    pw32, pb32 = prepare_armlp(params, masks, compute_dtype=jnp.float32)
    out32 = jax.block_until_ready(armlp_forward(x, pw32, pb32))
    assert out32.shape == (batch, nout)
    np.testing.assert_allclose(np.asarray(out32), np.asarray(ref),
                               rtol=1e-5, atol=1e-5)

    # --- bf16 fast path (v6e/v7x MXU-native), f32 accumulation: loose tol ---
    pwbf, pbbf = prepare_armlp(params, masks, compute_dtype=jnp.bfloat16)
    outbf = jax.block_until_ready(armlp_forward(x, pwbf, pbbf))
    np.testing.assert_allclose(np.asarray(outbf), np.asarray(ref),
                               rtol=5e-2, atol=5e-2)

    # --- larger batch: exercises the batch grid / pipelining (grid=(2,)) ---
    key, kx2 = jax.random.split(key)
    x_big = jax.random.normal(kx2, (512, nin), jnp.float32)
    ref_big = ref_forward(x_big, params, masks)
    out_big = jax.block_until_ready(armlp_forward(x_big, pwbf, pbbf))
    np.testing.assert_allclose(np.asarray(out_big), np.asarray(ref_big),
                               rtol=5e-2, atol=5e-2)

    print("KERNEL_OK")
</pallas_src>

<mosaic_0001>
module attributes {stable_mosaic.version = 11 : i64} {
  func.func @armlp_kernel(%arg0: i32, %arg1: memref<8x4xf32, #tpu.memory_space<vmem>>, %arg2: memref<4x128xf32, #tpu.memory_space<vmem>>, %arg3: memref<1x128xf32, #tpu.memory_space<vmem>>, %arg4: memref<128x128xf32, #tpu.memory_space<vmem>>, %arg5: memref<1x128xf32, #tpu.memory_space<vmem>>, %arg6: memref<128x128xf32, #tpu.memory_space<vmem>>, %arg7: memref<1x128xf32, #tpu.memory_space<vmem>>, %arg8: memref<128x8xf32, #tpu.memory_space<vmem>>, %arg9: memref<1x8xf32, #tpu.memory_space<vmem>>, %arg10: memref<8x8xf32, #tpu.memory_space<vmem>>) attributes {dimension_semantics = [#tpu.dimension_semantics<parallel>], iteration_bounds = array<i64: 1>, scalar_prefetch = 0 : i64, scratch_operands = 0 : i64, tpu.core_type = #tpu.core_type<tc>, window_params = [{transform_indices = @transform_0, window_bounds = array<i64: 8, 4>}, {pipeline_mode = #tpu.pipeline_mode<synchronous>, transform_indices = @transform_1, window_bounds = array<i64: 4, 128>}, {pipeline_mode = #tpu.pipeline_mode<synchronous>, transform_indices = @transform_2, window_bounds = array<i64: 1, 128>}, {pipeline_mode = #tpu.pipeline_mode<synchronous>, transform_indices = @transform_3, window_bounds = array<i64: 128, 128>}, {pipeline_mode = #tpu.pipeline_mode<synchronous>, transform_indices = @transform_4, window_bounds = array<i64: 1, 128>}, {pipeline_mode = #tpu.pipeline_mode<synchronous>, transform_indices = @transform_5, window_bounds = array<i64: 128, 128>}, {pipeline_mode = #tpu.pipeline_mode<synchronous>, transform_indices = @transform_6, window_bounds = array<i64: 1, 128>}, {pipeline_mode = #tpu.pipeline_mode<synchronous>, transform_indices = @transform_7, window_bounds = array<i64: 128, 8>}, {pipeline_mode = #tpu.pipeline_mode<synchronous>, transform_indices = @transform_8, window_bounds = array<i64: 1, 8>}, {transform_indices = @transform_9, window_bounds = array<i64: 8, 8>}]} {
    %c0 = arith.constant 0 : index
    %c0_0 = arith.constant 0 : index
    %0 = vector.load %arg1[%c0, %c0_0] : memref<8x4xf32, #tpu.memory_space<vmem>>, vector<8x4xf32>
    %c0_1 = arith.constant 0 : index
    %c0_2 = arith.constant 0 : index
    %1 = vector.load %arg2[%c0_1, %c0_2] : memref<4x128xf32, #tpu.memory_space<vmem>>, vector<4x128xf32>
    %cst = arith.constant dense<0.000000e+00> : vector<8x128xf32>
    %2 = tpu.matmul %0, %1, %cst {dimension_numbers = #tpu.dot_dimension_numbers<[1], [0], [0], [1], [0, 0, 1, 1], [], []>} : vector<8x4xf32>, vector<4x128xf32>, vector<8x128xf32> -> vector<8x128xf32>
    %c0_3 = arith.constant 0 : index
    %c0_4 = arith.constant 0 : index
    %3 = vector.load %arg3[%c0_3, %c0_4] : memref<1x128xf32, #tpu.memory_space<vmem>>, vector<1x128xf32>
    %4 = vector.broadcast %3 : vector<1x128xf32> to vector<8x128xf32>
    %5 = arith.addf %2, %4 : vector<8x128xf32>
    %cst_5 = arith.constant 0.000000e+00 : f32
    %6 = vector.broadcast %cst_5 : f32 to vector<8x128xf32>
    %7 = arith.maximumf %5, %6 : vector<8x128xf32>
    %c0_6 = arith.constant 0 : index
    %c0_7 = arith.constant 0 : index
    %8 = vector.load %arg4[%c0_6, %c0_7] : memref<128x128xf32, #tpu.memory_space<vmem>>, vector<128x128xf32>
    %cst_8 = arith.constant dense<0.000000e+00> : vector<8x128xf32>
    %9 = tpu.matmul %7, %8, %cst_8 {dimension_numbers = #tpu.dot_dimension_numbers<[1], [0], [0], [1], [0, 0, 1, 1], [], []>} : vector<8x128xf32>, vector<128x128xf32>, vector<8x128xf32> -> vector<8x128xf32>
    %c0_9 = arith.constant 0 : index
    %c0_10 = arith.constant 0 : index
    %10 = vector.load %arg5[%c0_9, %c0_10] : memref<1x128xf32, #tpu.memory_space<vmem>>, vector<1x128xf32>
    %11 = vector.broadcast %10 : vector<1x128xf32> to vector<8x128xf32>
    %12 = arith.addf %9, %11 : vector<8x128xf32>
    %cst_11 = arith.constant 0.000000e+00 : f32
    %13 = vector.broadcast %cst_11 : f32 to vector<8x128xf32>
    %14 = arith.maximumf %12, %13 : vector<8x128xf32>
    %c0_12 = arith.constant 0 : index
    %c0_13 = arith.constant 0 : index
    %15 = vector.load %arg6[%c0_12, %c0_13] : memref<128x128xf32, #tpu.memory_space<vmem>>, vector<128x128xf32>
    %cst_14 = arith.constant dense<0.000000e+00> : vector<8x128xf32>
    %16 = tpu.matmul %14, %15, %cst_14 {dimension_numbers = #tpu.dot_dimension_numbers<[1], [0], [0], [1], [0, 0, 1, 1], [], []>} : vector<8x128xf32>, vector<128x128xf32>, vector<8x128xf32> -> vector<8x128xf32>
    %c0_15 = arith.constant 0 : index
    %c0_16 = arith.constant 0 : index
    %17 = vector.load %arg7[%c0_15, %c0_16] : memref<1x128xf32, #tpu.memory_space<vmem>>, vector<1x128xf32>
    %18 = vector.broadcast %17 : vector<1x128xf32> to vector<8x128xf32>
    %19 = arith.addf %16, %18 : vector<8x128xf32>
    %cst_17 = arith.constant 0.000000e+00 : f32
    %20 = vector.broadcast %cst_17 : f32 to vector<8x128xf32>
    %21 = arith.maximumf %19, %20 : vector<8x128xf32>
    %c0_18 = arith.constant 0 : index
    %c0_19 = arith.constant 0 : index
    %22 = vector.load %arg8[%c0_18, %c0_19] : memref<128x8xf32, #tpu.memory_space<vmem>>, vector<128x8xf32>
    %cst_20 = arith.constant dense<0.000000e+00> : vector<8x8xf32>
    %23 = tpu.matmul %21, %22, %cst_20 {dimension_numbers = #tpu.dot_dimension_numbers<[1], [0], [0], [1], [0, 0, 1, 1], [], []>} : vector<8x128xf32>, vector<128x8xf32>, vector<8x8xf32> -> vector<8x8xf32>
    %c0_21 = arith.constant 0 : index
    %c0_22 = arith.constant 0 : index
    %24 = vector.load %arg9[%c0_21, %c0_22] : memref<1x8xf32, #tpu.memory_space<vmem>>, vector<1x8xf32>
    %25 = vector.broadcast %24 : vector<1x8xf32> to vector<8x8xf32>
    %26 = arith.addf %23, %25 : vector<8x8xf32>
    %c0_23 = arith.constant 0 : index
    %c0_24 = arith.constant 0 : index
    %27 = vector.load %arg10[%c0_23, %c0_24] : memref<8x8xf32, #tpu.memory_space<vmem>>, vector<8x8xf32>
    tpu.vector_store %arg10[%c0_23, %c0_24], %26 {strides = array<i32>} : memref<8x8xf32, #tpu.memory_space<vmem>>, vector<8x8xf32>,
    return
  }
  func.func @transform_0(%arg0: i32) -> (i32, i32) {
    %c0_i32 = arith.constant 0 : i32
    %c0_i32_0 = arith.constant 0 : i32
    return %arg0, %c0_i32 : i32, i32
  }
  func.func @transform_1(%arg0: i32) -> (i32, i32) {
    %c0_i32 = arith.constant 0 : i32
    %c0_i32_0 = arith.constant 0 : i32
    %c0_i32_1 = arith.constant 0 : i32
    return %c0_i32, %c0_i32_0 : i32, i32
  }
  func.func @transform_2(%arg0: i32) -> (i32, i32) {
    %c0_i32 = arith.constant 0 : i32
    %c0_i32_0 = arith.constant 0 : i32
    %c0_i32_1 = arith.constant 0 : i32
    return %c0_i32, %c0_i32_0 : i32, i32
  }
  func.func @transform_3(%arg0: i32) -> (i32, i32) {
    %c0_i32 = arith.constant 0 : i32
    %c0_i32_0 = arith.constant 0 : i32
    %c0_i32_1 = arith.constant 0 : i32
    return %c0_i32, %c0_i32_0 : i32, i32
  }
  func.func @transform_4(%arg0: i32) -> (i32, i32) {
    %c0_i32 = arith.constant 0 : i32
    %c0_i32_0 = arith.constant 0 : i32
    %c0_i32_1 = arith.constant 0 : i32
    return %c0_i32, %c0_i32_0 : i32, i32
  }
  func.func @transform_5(%arg0: i32) -> (i32, i32) {
    %c0_i32 = arith.constant 0 : i32
    %c0_i32_0 = arith.constant 0 : i32
    %c0_i32_1 = arith.constant 0 : i32
    return %c0_i32, %c0_i32_0 : i32, i32
  }
  func.func @transform_6(%arg0: i32) -> (i32, i32) {
    %c0_i32 = arith.constant 0 : i32
    %c0_i32_0 = arith.constant 0 : i32
    %c0_i32_1 = arith.constant 0 : i32
    return %c0_i32, %c0_i32_0 : i32, i32
  }
  func.func @transform_7(%arg0: i32) -> (i32, i32) {
    %c0_i32 = arith.constant 0 : i32
    %c0_i32_0 = arith.constant 0 : i32
    %c0_i32_1 = arith.constant 0 : i32
    return %c0_i32, %c0_i32_0 : i32, i32
  }
  func.func @transform_8(%arg0: i32) -> (i32, i32) {
    %c0_i32 = arith.constant 0 : i32
    %c0_i32_0 = arith.constant 0 : i32
    %c0_i32_1 = arith.constant 0 : i32
    return %c0_i32, %c0_i32_0 : i32, i32
  }
  func.func @transform_9(%arg0: i32) -> (i32, i32) {
    %c0_i32 = arith.constant 0 : i32
    %c0_i32_0 = arith.constant 0 : i32
    return %arg0, %c0_i32 : i32, i32
  }
}

</mosaic_0001>

<bundles_post_ra>
// kernel: _armlp_pallas.1
= control target key start
LH: loop header
LB: loop body
LE: loop exit
PB: predicated region body
PF: predicated region fallthrough
CT: control target
= control target key end

     0   :  { %14 = vsyncpa [#allocation3], 0  ;;  %s957_s0 = inlined_call_operand.vmem [shape: f32[8,4], index: 0, kind: input, shape index: {}]   ;;  %s958_s1 = inlined_call_operand.vmem [shape: f32[4,128], index: 1, kind: input, shape index: {}]   ;;  %s959_s2 = inlined_call_operand.vmem [shape: f32[1,128], index: 2, kind: input, shape index: {}]   ;;  %s960_s3 = inlined_call_operand.vmem [shape: f32[128,128], index: 3, kind: input, shape index: {}]   ;;  %s961_s4 = inlined_call_operand.vmem [shape: f32[1,128], index: 4, kind: input, shape index: {}]   ;;  %s962_s5 = inlined_call_operand.hbm [shape: f32[128,128], index: 5, kind: input, shape index: {}]   ;;  %s963_s6 = inlined_call_operand.vmem [shape: f32[1,128], index: 6, kind: input, shape index: {}]   ;;  %s964_s7 = inlined_call_operand.vmem [shape: f32[128,8], index: 7, kind: input, shape index: {}]   ;;  %s965_s8 = inlined_call_operand.vmem [shape: f32[1,8], index: 8, kind: input, shape index: {}]   ;;  %s966_s9 = inlined_call_operand.hbm [shape: f32[8,8], index: 9, kind: output, shape index: {}]  }
   0x1   :  { %15 = vsyncpa [#allocation4], 0  ;;  %s729_s30 = smov [#allocation2]   ;;  %s681_s13 = scalar_lea.hbm %s962_s5, 2048 }
   0x2   :  { %s31_s10 = sshll.u32 %s729_s30, 4  ;;  %p682_p0 = scmp.ne.s32.totalorder %s962_s5, %s681_s13  ;;  %s32_s10 = int_to_ptr.vmem [resolvable:$true] %s31_s10 }
   0x3   :  { %p685_p1 = scmp.lt.u32.totalorder %s681_s13, %s962_s5 }
   0x5   :  { %p687_p2 = pnand %p685_p1, %p682_p0 }
   0x7   :  { %690 = shalt.err (!%p687_p2)
}
   0x8   :  { %s691_s18 = scalar_lea.vmem %s32_s10, 2048  ;;  %p696_p4 = scmp.lt.s32.totalorder %s32_s10, %s32_s10 }
   0x9   :  { %p692_p3 = scmp.ne.s32.totalorder %s32_s10, %s691_s18  ;;  %p697_p5 = scmp.lt.s32.totalorder %s691_s18, %s691_s18 }
   0xb   :  { %p698_p6 = por %p697_p5, %p696_p4 }
   0xd   :  { %p699_p7 = pnand %p698_p6, %p692_p3 }
   0xf   :  { %702 = shalt.err (!%p699_p7)
}
  0x10   :  { %s730_s19 = smov 128   ;;  %s731_s20 = smov 8  }
  0x11   :  { %37 = dma.hbm_to_vmem [thread:$0]  %s962_s5, 2048, %s32_s10, [#allocation3], %s730_s19, %s730_s19, %s731_s20  }
  0x12   :  { %725 = dma.done.wait [#allocation3], 2048  }
  0x13   :  { %726 = vsyncadd [#allocation3], 4294965248  ;;  %v732_v0 = vmov 0.0   ;;  %vm733_vm0 = vmmov 0   ;;  %v734_v1 = vmov 0.0|0.0   ;;  %vm60_vm1 = vcmask 1043456  }
  0x14   :  { %492 = vmatprep.subr.mxu0 %v732_v0  ;;  %494 = vmatprep.mubr.msk.f32.mxu0 %vm733_vm0, %v732_v0  ;;  %vm56_vm2 = vcmask 31744   ;;  %v48_v2 = vld [vmem:[%s958_s1] sm:$0xf]  ;;  %v136_v5 = vld [vmem:[%s960_s3 + $0x8] sm:$0xff]  ;;  %v137_v6 = vld [vmem:[%s960_s3 + $0x10] sm:$0xff]  ;;  %s735_s22 = smov [#allocation5]  }
  0x15   :  { %602 = vmatprep.subr.bf16.mxu1 %v734_v1  ;;  %529 = vmatprep.mubr.msk.f32.mxu1 %vm733_vm0, %v732_v0  ;;  %v47_v3 = vld [vmem:[%s957_s0] sm:$0xff]  ;;  %v138_v7 = vld [vmem:[%s960_s3 + $0x18] sm:$0xff]  ;;  %v140_v11 = vld [vmem:[%s960_s3 + $0x28] sm:$0xff]  ;;  %s424_s23 = sshll.u32 %s735_s22, 4  ;;  %vm416_vm3 = vcmask 64512   ;;  %s425_s23 = int_to_ptr.vmem [resolvable:$true] %s424_s23 }
  0x16   :  { %v135_v4 = vld [vmem:[%s960_s3] sm:$0xff]  ;;  %493 = vmatpush3.msk.msra.mxu0 %vm60_vm1, %v48_v2  ;;  %v606_v9 = vpack.c.bf16 %v138_v7, %v137_v6  ;;  %v141_v13 = vld [vmem:[%s960_s3 + $0x30] sm:$0xff]  ;;  %v142_v14 = vld [vmem:[%s960_s3 + $0x38] sm:$0xff]  ;;  %p708_p9 = scmp.lt.s32.totalorder %s425_s23, %s425_s23 }
  0x17   :  { %495 = vmatmul.mubr.msk.f32.vlgmr.msra.gmra.mrb[0].mxu0 %vm56_vm2, %v47_v3  ;;  %v603_v8 = vpack.c.bf16 %v136_v5, %v135_v4  ;;  %626 = vmatprep.subr.bf16.mxu0 %v734_v1  ;;  %v139_v10 = vld [vmem:[%s960_s3 + $0x20] sm:$0xff]  ;;  %v612_v15 = vpack.c.bf16 %v142_v14, %v141_v13  ;;  %v144_v17 = vld [vmem:[%s960_s3 + $0x48] sm:$0xff]  ;;  %v145_v19 = vld [vmem:[%s960_s3 + $0x50] sm:$0xff] }
  0x18   :  { %564 = vmatprep.mubr.msk.f32.mxu0 %vm733_vm0, %v732_v0  ;;  %v609_v12 = vpack.c.bf16 %v140_v11, %v139_v10  ;;  %v143_v16 = vld [vmem:[%s960_s3 + $0x40] sm:$0xff]  ;;  %v146_v20 = vld [vmem:[%s960_s3 + $0x58] sm:$0xff]  ;;  %v148_v23 = vld [vmem:[%s960_s3 + $0x68] sm:$0xff] }
  0x19   :  { %604 = vmatpush3.bf16.msra.mxu1 %v603_v8  ;;  %v615_v18 = vpack.c.bf16 %v144_v17, %v143_v16  ;;  %v618_v21 = vpack.c.bf16 %v146_v20, %v145_v19  ;;  %v147_v22 = vld [vmem:[%s960_s3 + $0x60] sm:$0xff]  ;;  %v149_v25 = vld [vmem:[%s960_s3 + $0x70] sm:$0xff]  ;;  %v150_v26 = vld [vmem:[%s960_s3 + $0x78] sm:$0xff] }
  0x1a   :  { %605 = vmatprep.subr.bf16.mxu1 %v734_v1  ;;  %v621_v24 = vpack.c.bf16 %v148_v23, %v147_v22  ;;  %v624_v27 = vpack.c.bf16 %v150_v26, %v149_v25  ;;  %v229_v28 = vld [vmem:[#allocation2] sm:$0xff]  ;;  %v230_v29 = vld [vmem:[#allocation2 + $0x8] sm:$0xff]  ;;  %v231_v30 = vld [vmem:[#allocation2 + $0x10] sm:$0xff] }
  0x1b   :  { %v627_v31 = vpack.c.bf16 %v230_v29, %v229_v28  ;;  %v232_v32 = vld [vmem:[#allocation2 + $0x18] sm:$0xff]  ;;  %v233_v34 = vld [vmem:[#allocation2 + $0x20] sm:$0xff]  ;;  %v234_v35 = vld [vmem:[#allocation2 + $0x28] sm:$0xff] }
  0x1c   :  { %v630_v33 = vpack.c.bf16 %v232_v32, %v231_v30  ;;  %v633_v36 = vpack.c.bf16 %v234_v35, %v233_v34  ;;  %v235_v37 = vld [vmem:[#allocation2 + $0x30] sm:$0xff]  ;;  %v236_v38 = vld [vmem:[#allocation2 + $0x38] sm:$0xff]  ;;  %v237_v40 = vld [vmem:[#allocation2 + $0x40] sm:$0xff] }
  0x1d   :  { %607 = vmatpush3.bf16.msra.mxu1 %v606_v9  ;;  %628 = vmatpush3.bf16.msra.mxu0 %v627_v31  ;;  %v636_v39 = vpack.c.bf16 %v236_v38, %v235_v37  ;;  %v238_v41 = vld [vmem:[#allocation2 + $0x48] sm:$0xff]  ;;  %v239_v43 = vld [vmem:[#allocation2 + $0x50] sm:$0xff]  ;;  %v240_v44 = vld [vmem:[#allocation2 + $0x58] sm:$0xff] }
  0x1e   :  { %608 = vmatprep.subr.bf16.mxu1 %v734_v1  ;;  %629 = vmatprep.subr.bf16.mxu0 %v734_v1  ;;  %v639_v42 = vpack.c.bf16 %v238_v41, %v237_v40  ;;  %v642_v45 = vpack.c.bf16 %v240_v44, %v239_v43  ;;  %v241_v46 = vld [vmem:[#allocation2 + $0x60] sm:$0xff]  ;;  %v242_v47 = vld [vmem:[#allocation2 + $0x68] sm:$0xff]  ;;  %v433_v49 = vld [vmem:[%s959_s2] ss:$0 sm:$0xff] }
  0x1f   :  { %v645_v48 = vpack.c.bf16 %v242_v47, %v241_v46  ;;  %v243_v54 = vld [vmem:[#allocation2 + $0x70] sm:$0xff]  ;;  %v244_v55 = vld [vmem:[#allocation2 + $0x78] sm:$0xff]  ;;  %v324_v58 = vld [vmem:[%s964_s7 + $0x8] sm:$0xff] }
  0x20   :  { %v648_v56 = vpack.c.bf16 %v244_v55, %v243_v54  ;;  %v323_v57 = vld [vmem:[%s964_s7] sm:$0xff]  ;;  %v325_v59 = vld [vmem:[%s964_s7 + $0x10] sm:$0xff]  ;;  %v326_v61 = vld [vmem:[%s964_s7 + $0x18] sm:$0xff] }
  0x21   :  { %610 = vmatpush3.bf16.msra.mxu1 %v609_v12  ;;  %631 = vmatpush3.bf16.msra.mxu0 %v630_v33  ;;  %v651_v60 = vpack.c.bf16 %v324_v58, %v323_v57  ;;  %v654_v62 = vpack.c.bf16 %v326_v61, %v325_v59  ;;  %v327_v63 = vld [vmem:[%s964_s7 + $0x20] sm:$0xff]  ;;  %v329_v3 = vld [vmem:[%s964_s7 + $0x30] sm:$0xff]  ;;  %v330_v4 = vld [vmem:[%s964_s7 + $0x38] sm:$0xff] }
  0x22   :  { %611 = vmatprep.subr.bf16.mxu1 %v734_v1  ;;  %632 = vmatprep.subr.bf16.mxu0 %v734_v1  ;;  %v660_v5 = vpack.c.bf16 %v330_v4, %v329_v3  ;;  %v331_v6 = vld [vmem:[%s964_s7 + $0x40] sm:$0xff]  ;;  %v332_v7 = vld [vmem:[%s964_s7 + $0x48] sm:$0xff]  ;;  %v333_v9 = vld [vmem:[%s964_s7 + $0x50] sm:$0xff] }
  0x23   :  { %v663_v8 = vpack.c.bf16 %v332_v7, %v331_v6  ;;  %v334_v10 = vld [vmem:[%s964_s7 + $0x58] sm:$0xff]  ;;  %v335_v12 = vld [vmem:[%s964_s7 + $0x60] sm:$0xff]  ;;  %v336_v13 = vld [vmem:[%s964_s7 + $0x68] sm:$0xff] }
  0x24   :  { %v666_v11 = vpack.c.bf16 %v334_v10, %v333_v9  ;;  %v669_v14 = vpack.c.bf16 %v336_v13, %v335_v12  ;;  %v337_v20 = vld [vmem:[%s964_s7 + $0x70] sm:$0xff] }
  0x25   :  { %613 = vmatpush3.bf16.msra.mxu1 %v612_v15  ;;  %634 = vmatpush3.bf16.msra.mxu0 %v633_v36  ;;  %v436_v15 = vld [vmem:[%s961_s4] ss:$0 sm:$0xff] }
  0x26   :  { %614 = vmatprep.subr.bf16.mxu1 %v734_v1  ;;  %635 = vmatprep.subr.bf16.mxu0 %v734_v1 }
  0x29   :  { %616 = vmatpush3.bf16.msra.mxu1 %v615_v18  ;;  %637 = vmatpush3.bf16.msra.mxu0 %v636_v39 }
  0x2a   :  { %617 = vmatprep.subr.bf16.mxu1 %v734_v1  ;;  %638 = vmatprep.subr.bf16.mxu0 %v734_v1 }
  0x2d   :  { %619 = vmatpush3.bf16.msra.mxu1 %v618_v21  ;;  %640 = vmatpush3.bf16.msra.mxu0 %v639_v42  ;;  %v338_v21 = vld [vmem:[%s964_s7 + $0x78] sm:$0xff] }
  0x2e   :  { %620 = vmatprep.subr.bf16.mxu1 %v734_v1  ;;  %641 = vmatprep.subr.bf16.mxu0 %v734_v1  ;;  %v672_v22 = vpack.c.bf16 %v338_v21, %v337_v20 }
  0x31   :  { %622 = vmatpush3.bf16.msra.mxu1 %v621_v24  ;;  %643 = vmatpush3.bf16.msra.mxu0 %v642_v45 }
  0x32   :  { %623 = vmatprep.subr.bf16.mxu1 %v734_v1  ;;  %644 = vmatprep.subr.bf16.mxu0 %v734_v1 }
  0x35   :  { %625 = vmatpush3.bf16.msra.mxu1 %v624_v27  ;;  %646 = vmatpush3.bf16.msra.mxu0 %v645_v48  ;;  %v438_v27 = vld [vmem:[%s965_s8] ss:$0 sm:$0xff] }
  0x36   :  { %650 = vmatprep.subr.bf16.mxu1 %v734_v1  ;;  %647 = vmatprep.subr.bf16.mxu0 %v734_v1 }
  0x39   :  { %649 = vmatpush3.bf16.msra.mxu0 %v648_v56 }
  0xea   :  { %v130_v50 = vpop.f32.mrb[0].mxu0 }
  0xeb   :  { %v131_v51 = vadd.f32 %v433_v49, %v130_v50  ;;  %v496_v52 = vpop.f32.mrb[1].mxu0 }
  0xed   :  { %v134_v53 = vmax.f32 %v131_v51, 0.0 }
  0xef   :  { %530 = vmatmul.mubr.f32.vlgmr.msra.gmra.mrb[0].mxu1 %v134_v53 }
  0xf0   :  { %599 = vmatprep.mubr.msk.f32.mxu1 %vm733_vm0, %v732_v0  ;;  %652 = vmatpush3.bf16.msra.mxu1 %v651_v60  ;;  %v328_v0 = vld [vmem:[%s964_s7 + $0x28] sm:$0xff]  ;;  %s703_s7 = scalar_lea.vmem %s425_s23, 128 }
  0xf1   :  { %653 = vmatprep.subr.bf16.mxu1 %v734_v1  ;;  %v657_v2 = vpack.c.bf16 %v328_v0, %v327_v63  ;;  %p704_p8 = scmp.ne.s32.totalorder %s425_s23, %s703_s7  ;;  %p709_p10 = scmp.lt.s32.totalorder %s703_s7, %s703_s7 }
  0xf3   :  { %p710_p11 = por %p709_p10, %p708_p9 }
  0xf4   :  { %655 = vmatpush3.bf16.msra.mxu1 %v654_v62 }
  0xf5   :  { %656 = vmatprep.subr.bf16.mxu1 %v734_v1  ;;  %p711_p12 = pnand %p710_p11, %p704_p8 }
  0xf8   :  { %658 = vmatpush3.bf16.msra.mxu1 %v657_v2 }
  0xf9   :  { %659 = vmatprep.subr.bf16.mxu1 %v734_v1 }
  0xfc   :  { %661 = vmatpush3.bf16.msra.mxu1 %v660_v5 }
  0xfd   :  { %662 = vmatprep.subr.bf16.mxu1 %v734_v1 }
 0x100   :  { %664 = vmatpush3.bf16.msra.mxu1 %v663_v8 }
 0x101   :  { %665 = vmatprep.subr.bf16.mxu1 %v734_v1 }
 0x104   :  { %667 = vmatpush3.bf16.msra.mxu1 %v666_v11 }
 0x105   :  { %668 = vmatprep.subr.bf16.mxu1 %v734_v1 }
 0x108   :  { %670 = vmatpush3.bf16.msra.mxu1 %v669_v14 }
 0x109   :  { %671 = vmatprep.subr.bf16.mxu1 %v734_v1  ;;  %v437_v1 = vld [vmem:[%s963_s6] ss:$0 sm:$0xff] }
 0x10c   :  { %673 = vmatpush3.bf16.msra.mxu1 %v672_v22 }
 0x1c2   :  { %v224_v16 = vpop.f32.mrb[0].mxu1 }
 0x1c3   :  { %v225_v17 = vadd.f32 %v436_v15, %v224_v16  ;;  %v531_v18 = vpop.f32.mrb[1].mxu1 }
 0x1c5   :  { %v228_v19 = vmax.f32 %v225_v17, 0.0 }
 0x1c7   :  { %565 = vmatmul.mubr.f32.vlgmr.msra.gmra.mrb[2].mxu0 %v228_v19 }
 0x29a   :  { %v318_v23 = vpop.f32.mrb[2].mxu0 }
 0x29b   :  { %v319_v24 = vadd.f32 %v437_v1, %v318_v23  ;;  %v566_v25 = vpop.f32.mrb[3].mxu0 }
 0x29d   :  { %v322_v26 = vmax.f32 %v319_v24, 0.0 }
 0x29f   :  { %600 = vmatmul.mubr.f32.vlgmr.msra.gmra.mrb[2].mxu1 %v322_v26 }
 0x372   :  { %v412_v28 = vpop.f32.mrb[2].mxu1 }
 0x373   :  { %v413_v29 = vadd.f32 %v438_v27, %v412_v28  ;;  %v601_v30 = vpop.f32.mrb[3].mxu1 }
 0x375   :  { %417 = vst.msk [vmem:[#allocation5] sm:$0xff] %vm416_vm3, %v413_v29 }
 0x376   :  { %714 = shalt.err (!%p711_p12)
}
 0x377   :  { %s715_s5 = scalar_lea.hbm %s966_s9, 128 }
 0x378   :  { %p716_p13 = scmp.ne.s32.totalorder %s966_s9, %s715_s5  ;;  %p719_p0 = scmp.lt.u32.totalorder %s715_s5, %s966_s9 }
 0x37a   :  { %p721_p1 = pnand %p719_p0, %p716_p13 }
 0x37c   :  { %724 = shalt.err (!%p721_p1)
}
 0x37d   :  { %427 = dma.vmem_to_hbm [thread:$0]  %s425_s23, 128, %s966_s9, [#allocation4]  }
 0x37e   :  { %727 = dma.done.wait [#allocation4], 128  }
 0x37f   :  { %728 = vsyncadd [#allocation4], 4294967168 }
 0x380   :  { %431 = vsyncpa [#allocation3], 1 }
 0x381   :  { %432 = vsyncpa [#allocation4], 1 }

</bundles_post_ra>
